<compile_context>
chip_gen: v7x
topology: tpu7x:2x2x1
jax: 0.10.0
libtpu: 0.0.40
codegen_flags: <defaults>
</compile_context>

<pallas_src>
import math

import jax
import jax.numpy as jnp
from jax.experimental import pallas as pl
from jax.experimental.pallas import tpu as pltpu

_GELU_C = math.sqrt(2.0 / math.pi)  # sqrt(2/pi), matches the PyTorch GELU module


def _ffn_kernel(x_ref, w1_ref, b1_ref, w2_ref, b2_ref, o_ref, acc_ref):
    h = pl.program_id(1)

    @pl.when(h == 0)
    def _():
        acc_ref[...] = jnp.zeros_like(acc_ref)

    # Matmul 1 tile: (tm, C) @ (C, th) -> (tm, th); bf16 operands, fp32 accum (MXU).
    z = jnp.dot(x_ref[...], w1_ref[...], preferred_element_type=jnp.float32)
    z = z + b1_ref[...]  # b1 kept in f32

    # Tanh-approx GELU (exact PyTorch formula), polynomial factored to save a vmul;
    # tanh goes to the EUP slot.  Stays in vregs / VMEM.
    inner = _GELU_C * (z * (1.0 + 0.044715 * (z * z)))
    g = (0.5 * z) * (1.0 + jnp.tanh(inner))

    # Matmul 2 tile: (tm, th) @ (th, C) accumulated over the hidden axis in fp32.
    acc_ref[...] += jnp.dot(g.astype(w2_ref.dtype), w2_ref[...],
                            preferred_element_type=jnp.float32)

    @pl.when(h == pl.num_programs(1) - 1)
    def _():
        o_ref[...] = (acc_ref[...] + b2_ref[...]).astype(o_ref.dtype)


def _pick_hidden_tile(H, max_tile):
    """Largest tile dividing H, preferring multiples of 256 (v6e/v7x 256x256 MXU),
    then 128 (v5e MXU / lane width); falls back to the full axis."""
    for mult in (256, 128):
        best = 0
        t = mult
        while t <= min(H, max_tile):
            if H % t == 0:
                best = t
            t += mult
        if best:
            return best
    return H


def feed_forward(x, w1, b1, w2, b2, *, row_tile=1024, hidden_tile=1024,
                 matmul_dtype=jnp.bfloat16):
    """FeedForward forward pass: gelu(x @ w1 + b1) @ w2 + b2.

    x : [..., C]   w1: [C, H]   b1: [H]   w2: [H, C]   b2: [C]   (H = 4*C)
    """
    orig_shape = x.shape
    C = orig_shape[-1]
    H = w1.shape[1]
    assert w1.shape == (C, H) and w2.shape == (H, C)
    assert b1.shape == (H,) and b2.shape == (C,)

    out_dtype = x.dtype
    xm = x.reshape(-1, C)
    M = xm.shape[0]

    # bf16 operands for the MXU (fp32 accumulation happens in the kernel scratch).
    if matmul_dtype is not None:
        xm = xm.astype(matmul_dtype)
        w1 = w1.astype(matmul_dtype)
        w2 = w2.astype(matmul_dtype)
    b1_2d = b1.reshape(1, H).astype(jnp.float32)
    b2_2d = b2.reshape(1, C).astype(jnp.float32)

    x_bytes = jnp.dtype(xm.dtype).itemsize
    w_bytes = jnp.dtype(w1.dtype).itemsize
    o_bytes = jnp.dtype(out_dtype).itemsize

    # ---- tile selection, re-derived against the actual VMEM capacity ----------
    tm = M if M <= row_tile else row_tile       # row_tile is a multiple of 8
    th = _pick_hidden_tile(H, hidden_tile)      # always divides H (reduction axis)

    try:
        vmem_cap = int(pltpu.get_tpu_info().vmem_capacity_bytes)
    except Exception:
        vmem_cap = 64 * 1024 * 1024             # conservative (v7x per-TC VMEM)
    budget = (vmem_cap * 3) // 4

    def usage(tm_, th_):
        return (2 * tm_ * C * x_bytes           # x tile (double-buffered)
                + 2 * C * th_ * w_bytes         # W1 block
                + 2 * 8 * th_ * 4               # b1 block (sublane-padded)
                + 2 * th_ * C * w_bytes         # W2 block
                + 2 * 8 * C * 4                 # b2
                + 2 * tm_ * C * o_bytes         # output tile
                + tm_ * C * 4)                  # fp32 accumulator

    while usage(tm, th) > budget:
        if th > 256 and th % 256 == 0:
            th //= 2                            # stays a multiple of 128 and divides H
        elif tm > 256:
            tm = max(256, ((tm // 2) + 7) // 8 * 8)
        elif th > 128 and th % 256 == 0:
            th //= 2
        elif tm > 8:
            tm = max(8, (tm // 2) // 8 * 8)
        else:
            break                               # tiny problem; let the compiler cope

    grid = (pl.cdiv(M, tm), H // th)
    vmem_limit = int(min(vmem_cap, max(2 * usage(tm, th), 32 * 1024 * 1024)))
    dim_sem = ("parallel", "arbitrary") if grid[0] > 1 else ("arbitrary", "arbitrary")

    out = pl.pallas_call(
        _ffn_kernel,
        out_shape=jax.ShapeDtypeStruct((M, C), out_dtype),
        grid_spec=pltpu.PrefetchScalarGridSpec(
            num_scalar_prefetch=0,
            grid=grid,
            in_specs=[
                pl.BlockSpec((tm, C), lambda i, j: (i, 0)),   # x rows (resident over j)
                pl.BlockSpec((C, th), lambda i, j: (0, j)),   # W1 column block
                pl.BlockSpec((1, th), lambda i, j: (0, j)),   # b1 block
                pl.BlockSpec((th, C), lambda i, j: (j, 0)),   # W2 row block
                pl.BlockSpec((1, C), lambda i, j: (0, 0)),    # b2 (whole)
            ],
            out_specs=pl.BlockSpec((tm, C), lambda i, j: (i, 0)),
            scratch_shapes=[pltpu.VMEM((tm, C), jnp.float32)],
        ),
        compiler_params=pltpu.CompilerParams(
            dimension_semantics=dim_sem,
            vmem_limit_bytes=vmem_limit,
        ),
    )(xm, w1, b1_2d, w2, b2_2d)

    return out.reshape(orig_shape)


if __name__ == "__main__":
    key = jax.random.PRNGKey(0)
    B, T, C = 2, 8, 32          # cfg['emb_dim'] = 32, seq = 8, batch = 2
    H = 4 * C
    k1, k2, k3, k4, k5 = jax.random.split(key, 5)

    x = jax.random.normal(k1, (B, T, C), dtype=jnp.float32)
    w1 = jax.random.normal(k2, (C, H), dtype=jnp.float32) * (1.0 / math.sqrt(C))
    b1 = jax.random.normal(k3, (H,), dtype=jnp.float32) * 0.02
    w2 = jax.random.normal(k4, (H, C), dtype=jnp.float32) * (1.0 / math.sqrt(H))
    b2 = jax.random.normal(k5, (C,), dtype=jnp.float32) * 0.02

    y = feed_forward(x, w1, b1, w2, b2)
    y = jax.block_until_ready(y)

    # Pure-JAX fp32 reference (same tanh-approx GELU as the PyTorch module).
    # Kernel runs its matmuls with bf16 operands (fp32 accumulation), so the
    # tolerance is set for bf16 mixed precision.
    z_ref = x @ w1 + b1
    g_ref = 0.5 * z_ref * (1.0 + jnp.tanh(_GELU_C * (z_ref + 0.044715 * z_ref ** 3)))
    y_ref = g_ref @ w2 + b2

    assert y.shape == x.shape and y.dtype == x.dtype
    assert bool(jnp.allclose(y, y_ref, atol=3e-2, rtol=3e-2)), "mismatch vs reference"
    print("KERNEL_OK")
</pallas_src>

<mosaic_0001>
module attributes {stable_mosaic.version = 11 : i64} {
  func.func @_ffn_kernel(%arg0: i32, %arg1: i32, %arg2: memref<16x32xbf16, #tpu.memory_space<vmem>>, %arg3: memref<32x128xbf16, #tpu.memory_space<vmem>>, %arg4: memref<1x128xf32, #tpu.memory_space<vmem>>, %arg5: memref<128x32xbf16, #tpu.memory_space<vmem>>, %arg6: memref<1x32xf32, #tpu.memory_space<vmem>>, %arg7: memref<16x32xf32, #tpu.memory_space<vmem>>, %arg8: memref<16x32xf32, #tpu.memory_space<vmem>>) attributes {dimension_semantics = [#tpu.dimension_semantics<arbitrary>, #tpu.dimension_semantics<arbitrary>], iteration_bounds = array<i64: 1, 1>, scalar_prefetch = 0 : i64, scratch_operands = 1 : i64, tpu.core_type = #tpu.core_type<tc>, window_params = [{transform_indices = @transform_0, window_bounds = array<i64: 16, 32>}, {transform_indices = @transform_1, window_bounds = array<i64: 32, 128>}, {transform_indices = @transform_2, window_bounds = array<i64: 1, 128>}, {transform_indices = @transform_3, window_bounds = array<i64: 128, 32>}, {pipeline_mode = #tpu.pipeline_mode<synchronous>, transform_indices = @transform_4, window_bounds = array<i64: 1, 32>}, {transform_indices = @transform_5, window_bounds = array<i64: 16, 32>}]} {
    %c0_i32 = arith.constant 0 : i32
    %0 = arith.cmpi eq, %arg1, %c0_i32 : i32
    %1 = arith.extui %0 : i1 to i32
    %c0_i32_0 = arith.constant 0 : i32
    %2 = arith.cmpi ne, %1, %c0_i32_0 : i32
    scf.if %2 {
      %cst_20 = arith.constant 0.000000e+00 : f32
      %32 = vector.broadcast %cst_20 : f32 to vector<16x32xf32>
      %c0_21 = arith.constant 0 : index
      %c0_22 = arith.constant 0 : index
      %33 = vector.load %arg8[%c0_21, %c0_22] : memref<16x32xf32, #tpu.memory_space<vmem>>, vector<16x32xf32>
      tpu.vector_store %arg8[%c0_21, %c0_22], %32 {strides = array<i32>} : memref<16x32xf32, #tpu.memory_space<vmem>>, vector<16x32xf32>,
    } else {
    }
    %c0 = arith.constant 0 : index
    %c0_1 = arith.constant 0 : index
    %3 = vector.load %arg2[%c0, %c0_1] : memref<16x32xbf16, #tpu.memory_space<vmem>>, vector<16x32xbf16>
    %c0_2 = arith.constant 0 : index
    %c0_3 = arith.constant 0 : index
    %4 = vector.load %arg3[%c0_2, %c0_3] : memref<32x128xbf16, #tpu.memory_space<vmem>>, vector<32x128xbf16>
    %cst = arith.constant dense<0.000000e+00> : vector<16x128xf32>
    %5 = tpu.matmul %3, %4, %cst {dimension_numbers = #tpu.dot_dimension_numbers<[1], [0], [0], [1], [0, 0, 1, 1], [], []>} : vector<16x32xbf16>, vector<32x128xbf16>, vector<16x128xf32> -> vector<16x128xf32>
    %c0_4 = arith.constant 0 : index
    %c0_5 = arith.constant 0 : index
    %6 = vector.load %arg4[%c0_4, %c0_5] : memref<1x128xf32, #tpu.memory_space<vmem>>, vector<1x128xf32>
    %7 = vector.broadcast %6 : vector<1x128xf32> to vector<16x128xf32>
    %8 = arith.addf %5, %7 : vector<16x128xf32>
    %9 = arith.mulf %8, %8 : vector<16x128xf32>
    %cst_6 = arith.constant 4.471500e-02 : f32
    %10 = vector.broadcast %cst_6 : f32 to vector<16x128xf32>
    %11 = arith.mulf %10, %9 : vector<16x128xf32>
    %cst_7 = arith.constant 1.000000e+00 : f32
    %12 = vector.broadcast %cst_7 : f32 to vector<16x128xf32>
    %13 = arith.addf %12, %11 : vector<16x128xf32>
    %14 = arith.mulf %8, %13 : vector<16x128xf32>
    %cst_8 = arith.constant 0.797884583 : f32
    %15 = vector.broadcast %cst_8 : f32 to vector<16x128xf32>
    %16 = arith.mulf %15, %14 : vector<16x128xf32>
    %cst_9 = arith.constant 5.000000e-01 : f32
    %17 = vector.broadcast %cst_9 : f32 to vector<16x128xf32>
    %18 = arith.mulf %17, %8 : vector<16x128xf32>
    %19 = math.tanh %16 : vector<16x128xf32>
    %cst_10 = arith.constant 1.000000e+00 : f32
    %20 = vector.broadcast %cst_10 : f32 to vector<16x128xf32>
    %21 = arith.addf %20, %19 : vector<16x128xf32>
    %22 = arith.mulf %18, %21 : vector<16x128xf32>
    %c0_11 = arith.constant 0 : index
    %c0_12 = arith.constant 0 : index
    %23 = vector.load %arg8[%c0_11, %c0_12] : memref<16x32xf32, #tpu.memory_space<vmem>>, vector<16x32xf32>
    %24 = arith.truncf %22 : vector<16x128xf32> to vector<16x128xbf16>
    %c0_13 = arith.constant 0 : index
    %c0_14 = arith.constant 0 : index
    %25 = vector.load %arg5[%c0_13, %c0_14] : memref<128x32xbf16, #tpu.memory_space<vmem>>, vector<128x32xbf16>
    %cst_15 = arith.constant dense<0.000000e+00> : vector<16x32xf32>
    %26 = tpu.matmul %24, %25, %cst_15 {dimension_numbers = #tpu.dot_dimension_numbers<[1], [0], [0], [1], [0, 0, 1, 1], [], []>} : vector<16x128xbf16>, vector<128x32xbf16>, vector<16x32xf32> -> vector<16x32xf32>
    %27 = arith.addf %23, %26 : vector<16x32xf32>
    %c0_16 = arith.constant 0 : index
    %c0_17 = arith.constant 0 : index
    %28 = vector.load %arg8[%c0_16, %c0_17] : memref<16x32xf32, #tpu.memory_space<vmem>>, vector<16x32xf32>
    tpu.vector_store %arg8[%c0_16, %c0_17], %27 {strides = array<i32>} : memref<16x32xf32, #tpu.memory_space<vmem>>, vector<16x32xf32>,
    %c0_i32_18 = arith.constant 0 : i32
    %29 = arith.cmpi eq, %arg1, %c0_i32_18 : i32
    %30 = arith.extui %29 : i1 to i32
    %c0_i32_19 = arith.constant 0 : i32
    %31 = arith.cmpi ne, %30, %c0_i32_19 : i32
    scf.if %31 {
      %c0_20 = arith.constant 0 : index
      %c0_21 = arith.constant 0 : index
      %32 = vector.load %arg8[%c0_20, %c0_21] : memref<16x32xf32, #tpu.memory_space<vmem>>, vector<16x32xf32>
      %c0_22 = arith.constant 0 : index
      %c0_23 = arith.constant 0 : index
      %33 = vector.load %arg6[%c0_22, %c0_23] : memref<1x32xf32, #tpu.memory_space<vmem>>, vector<1x32xf32>
      %34 = vector.broadcast %33 : vector<1x32xf32> to vector<16x32xf32>
      %35 = arith.addf %32, %34 : vector<16x32xf32>
      %c0_24 = arith.constant 0 : index
      %c0_25 = arith.constant 0 : index
      %36 = vector.load %arg7[%c0_24, %c0_25] : memref<16x32xf32, #tpu.memory_space<vmem>>, vector<16x32xf32>
      tpu.vector_store %arg7[%c0_24, %c0_25], %35 {strides = array<i32>} : memref<16x32xf32, #tpu.memory_space<vmem>>, vector<16x32xf32>,
    } else {
    }
    return
  }
  func.func @transform_0(%arg0: i32, %arg1: i32) -> (i32, i32) {
    %c0_i32 = arith.constant 0 : i32
    %c0_i32_0 = arith.constant 0 : i32
    return %arg0, %c0_i32 : i32, i32
  }
  func.func @transform_1(%arg0: i32, %arg1: i32) -> (i32, i32) {
    %c0_i32 = arith.constant 0 : i32
    %c0_i32_0 = arith.constant 0 : i32
    return %c0_i32, %arg1 : i32, i32
  }
  func.func @transform_2(%arg0: i32, %arg1: i32) -> (i32, i32) {
    %c0_i32 = arith.constant 0 : i32
    %c0_i32_0 = arith.constant 0 : i32
    return %c0_i32, %arg1 : i32, i32
  }
  func.func @transform_3(%arg0: i32, %arg1: i32) -> (i32, i32) {
    %c0_i32 = arith.constant 0 : i32
    %c0_i32_0 = arith.constant 0 : i32
    return %arg1, %c0_i32 : i32, i32
  }
  func.func @transform_4(%arg0: i32, %arg1: i32) -> (i32, i32) {
    %c0_i32 = arith.constant 0 : i32
    %c0_i32_0 = arith.constant 0 : i32
    %c0_i32_1 = arith.constant 0 : i32
    return %c0_i32, %c0_i32_0 : i32, i32
  }
  func.func @transform_5(%arg0: i32, %arg1: i32) -> (i32, i32) {
    %c0_i32 = arith.constant 0 : i32
    %c0_i32_0 = arith.constant 0 : i32
    return %arg0, %c0_i32 : i32, i32
  }
}

</mosaic_0001>

<bundles_post_ra>
// kernel: tpu_custom_call.1
= control target key start
LH: loop header
LB: loop body
LE: loop exit
PB: predicated region body
PF: predicated region fallthrough
CT: control target
= control target key end

     0   :  { %v364_v1 = vmov 0.0   ;;  %vm365_vm0 = vmmov 0   ;;  %vm26_vm1 = vcmask 261120   ;;  %s457_s0 = inlined_call_operand.vmem [shape: bf16[16,32], index: 0, kind: input, shape index: {}]   ;;  %s458_s1 = inlined_call_operand.vmem [shape: bf16[32,128], index: 1, kind: input, shape index: {}]   ;;  %s459_s2 = inlined_call_operand.vmem [shape: f32[1,128], index: 2, kind: input, shape index: {}]   ;;  %s460_s3 = inlined_call_operand.vmem [shape: bf16[128,32], index: 3, kind: input, shape index: {}]   ;;  %s461_s4 = inlined_call_operand.vmem [shape: f32[1,32], index: 4, kind: input, shape index: {}]   ;;  %s462_s5 = inlined_call_operand.hbm [shape: f32[16,32], index: 5, kind: output, shape index: {}]  }
   0x1   :  { %v325_v0 = vld [vmem:[%s458_s1] sm:$0xff]   ;;  %292 = vmatprep.subr.bf16.mxu0 %v364_v1  ;;  %300 = vmatprep.subr.bf16.mxu1 %v364_v1  ;;  %v326_v2 = vld [vmem:[%s458_s1 + $0x8] sm:$0xff]   ;;  %27 = vst.msk [vmem:[#allocation2] sm:$0xff] %vm26_vm1, %v364_v1  ;;  %28 = vst.msk [vmem:[#allocation2 + $0x8] sm:$0xff] %vm26_vm1, %v364_v1 }
   0x2   :  { %293 = vmatpush3.bf16.msra.mxu0 %v325_v0  ;;  %296 = vmatprep.mubr.msk.bf16.mxu0 %vm365_vm0, %v364_v1  ;;  %v327_v3 = vld [vmem:[%s457_s0] sm:$0xff]  }
   0x3   :  { %294 = vmatprep.subr.bf16.mxu0 %v364_v1  ;;  %316 = vmatprep.mubr.msk.bf16.mxu1 %vm365_vm0, %v364_v1 }
   0x6   :  { %295 = vmatpush3.bf16.msra.mxu0 %v326_v2 }
   0x7   :  { %10 = vsyncpa [#allocation4], 0  ;;  %v328_v4 = vld [vmem:[%s460_s3] sm:$0xff]   ;;  %v329_v5 = vld [vmem:[%s460_s3 + $0x8] sm:$0xff]   ;;  %s366_s15 = smov [#allocation3]  }
   0x8   :  { %301 = vmatpush3.bf16.msra.mxu1 %v328_v4  ;;  %v330_v6 = vld [vmem:[%s460_s3 + $0x10] sm:$0xff]   ;;  %v331_v7 = vld [vmem:[%s460_s3 + $0x18] sm:$0xff]   ;;  %v332_v8 = vld [vmem:[%s460_s3 + $0x20] sm:$0xff]   ;;  %s255_s16 = sshll.u32 %s366_s15, 4  ;;  %s256_s16 = int_to_ptr.vmem [resolvable:$true] %s255_s16 }
   0x9   :  { %297 = vmatmul.mubr.msk.bf16.vlgmr.msra.gmra.mrb[0].mxu0 %vm26_vm1, %v327_v3  ;;  %302 = vmatprep.subr.bf16.mxu1 %v364_v1  ;;  %v333_v9 = vld [vmem:[%s460_s3 + $0x28] sm:$0xff]   ;;  %v334_v10 = vld [vmem:[%s460_s3 + $0x30] sm:$0xff]   ;;  %v335_v11 = vld [vmem:[%s460_s3 + $0x38] sm:$0xff]   ;;  %s340_s17 = scalar_lea.vmem %s256_s16, 256  ;;  %p345_p1 = scmp.lt.s32.totalorder %s256_s16, %s256_s16 }
   0xa   :  { %v266_v12 = vld [vmem:[%s459_s2] ss:$0 sm:$0xff]  ;;  %v123_v40 = vld [vmem:[#allocation2 + $0x8] sm:$0xff]  ;;  %p341_p0 = scmp.ne.s32.totalorder %s256_s16, %s340_s17  ;;  %p346_p2 = scmp.lt.s32.totalorder %s340_s17, %s340_s17 }
   0xb   :  { %v122_v38 = vld [vmem:[#allocation2] sm:$0xff] }
   0xc   :  { %303 = vmatpush3.bf16.msra.mxu1 %v329_v5  ;;  %v279_v46 = vld [vmem:[%s461_s4] ss:$0 sm:$0xff]  ;;  %p347_p3 = por %p346_p2, %p345_p1 }
   0xd   :  { %304 = vmatprep.subr.bf16.mxu1 %v364_v1 }
   0xe   :  { %p348_p4 = pnand %p347_p3, %p341_p0 }
  0x10   :  { %305 = vmatpush3.bf16.msra.mxu1 %v330_v6 }
  0x11   :  { %306 = vmatprep.subr.bf16.mxu1 %v364_v1 }
  0x14   :  { %307 = vmatpush3.bf16.msra.mxu1 %v331_v7 }
  0x15   :  { %308 = vmatprep.subr.bf16.mxu1 %v364_v1 }
  0x18   :  { %309 = vmatpush3.bf16.msra.mxu1 %v332_v8 }
  0x19   :  { %310 = vmatprep.subr.bf16.mxu1 %v364_v1 }
  0x1c   :  { %311 = vmatpush3.bf16.msra.mxu1 %v333_v9 }
  0x1d   :  { %312 = vmatprep.subr.bf16.mxu1 %v364_v1 }
  0x20   :  { %313 = vmatpush3.bf16.msra.mxu1 %v334_v10 }
  0x21   :  { %314 = vmatprep.subr.bf16.mxu1 %v364_v1 }
  0x24   :  { %315 = vmatpush3.bf16.msra.mxu1 %v335_v11 }
  0xdc   :  { %v97_v13 = vpop.f32.mrb[0].mxu0 }
  0xdd   :  { %v98_v14 = vadd.f32 %v266_v12, %v97_v13  ;;  %v298_v15 = vpop.f32.mrb[1].mxu0 }
  0xde   :  { %v100_v16 = vpop.f32.mrb[2].mxu0 }
  0xdf   :  { %v104_v17 = vmul.f32 %v98_v14, %v98_v14  ;;  %v101_v18 = vadd.f32 %v266_v12, %v100_v16  ;;  %v299_v19 = vpop.f32.mrb[3].mxu0  ;;  %v114_v32 = vmul.f32 0.5, %v98_v14 }
  0xe1   :  { %v106_v20 = vmul.f32 0.044715, %v104_v17  ;;  %v105_v21 = vmul.f32 %v101_v18, %v101_v18  ;;  %v115_v33 = vmul.f32 0.5, %v101_v18 }
  0xe3   :  { %v108_v22 = vadd.f32 1.0, %v106_v20  ;;  %v107_v23 = vmul.f32 0.044715, %v105_v21 }
  0xe5   :  { %v110_v24 = vmul.f32 %v108_v22, %v98_v14  ;;  %v109_v25 = vadd.f32 1.0, %v107_v23 }
  0xe7   :  { %v112_v26 = vmul.f32 0.7978846, %v110_v24  ;;  %v111_v27 = vmul.f32 %v109_v25, %v101_v18 }
  0xe9   :  { %336 = vtanh.f32 %v112_v26  ;;  %v113_v28 = vmul.f32 0.7978846, %v111_v27 }
  0xeb   :  { %338 = vtanh.f32 %v113_v28 }
  0xf3   :  { %v337_v29 = vpop.eup %336 }
  0xf4   :  { %v118_v30 = vadd.f32 1.0, %v337_v29 }
  0xf5   :  { %v339_v31 = vpop.eup %338 }
  0xf6   :  { %v119_v34 = vadd.f32 1.0, %v339_v31  ;;  %v120_v35 = vmul.f32 %v118_v30, %v114_v32 }
  0xf8   :  { %v121_v36 = vmul.f32 %v119_v34, %v115_v33 }
  0xfa   :  { %v124_v37 = vpack.c.bf16 %v121_v36, %v120_v35 }
  0xfc   :  { %317 = vmatmul.mubr.bf16.vlgmr.msra.gmra.mrb[0].mxu1 %v124_v37 }
 0x1cf   :  { %v223_v39 = vpop.f32.mrb[0].mxu1 }
 0x1d0   :  { %v230_v41 = vadd.f32 %v223_v39, %v122_v38  ;;  %v318_v42 = vpop.f32.mrb[1].mxu1 }
 0x1d1   :  { %v226_v43 = vpop.f32.mrb[2].mxu1 }
 0x1d2   :  { %232 = vst.msk [vmem:[#allocation2] sm:$0xff] %vm26_vm1, %v230_v41  ;;  %v231_v44 = vadd.f32 %v226_v43, %v123_v40  ;;  %v319_v45 = vpop.f32.mrb[3].mxu1 }
 0x1d4   :  { %233 = vst.msk [vmem:[#allocation2 + $0x8] sm:$0xff] %vm26_vm1, %v231_v44 }
 0x1d9   :  { %v237_v47 = vld [vmem:[#allocation2] sm:$0xff] }
 0x1da   :  { %v246_v48 = vadd.f32 %v279_v46, %v237_v47 }
 0x1db   :  { %v238_v49 = vld [vmem:[#allocation2 + $0x8] sm:$0xff] }
 0x1dc   :  { %v247_v50 = vadd.f32 %v279_v46, %v238_v49  ;;  %248 = vst.msk [vmem:[#allocation3] sm:$0xff] %vm26_vm1, %v246_v48 }
 0x1de   :  { %249 = vst.msk [vmem:[#allocation3 + $0x8] sm:$0xff] %vm26_vm1, %v247_v50 }
 0x1df   :  { %351 = shalt.err (!%p348_p4)
}
 0x1e0   :  { %s352_s19 = scalar_lea.hbm %s462_s5, 256 }
 0x1e1   :  { %p353_p5 = scmp.ne.s32.totalorder %s462_s5, %s352_s19  ;;  %p356_p6 = scmp.lt.u32.totalorder %s352_s19, %s462_s5 }
 0x1e3   :  { %p358_p7 = pnand %p356_p6, %p353_p5 }
 0x1e5   :  { %361 = shalt.err (!%p358_p7)
}
 0x1e6   :  { %s367_s24 = smov 128   ;;  %s368_s25 = smov 8  }
 0x1e7   :  { %261 = dma.vmem_to_hbm [thread:$0]  %s256_s16, 256, %s462_s5, [#allocation4], %s367_s24, %s367_s24, %s368_s25  }
 0x1e8   :  { %362 = dma.done.wait [#allocation4], 256  }
 0x1e9   :  { %363 = vsyncadd [#allocation4], 4294967040 }
 0x1ea   :  { %265 = vsyncpa [#allocation4], 1 }

</bundles_post_ra>
